<compile_context>
chip_gen: v7x
topology: tpu7x:2x2x1
jax: 0.10.0
libtpu: 0.0.40
codegen_flags: <defaults>
</compile_context>

<pallas_src>
import functools
import math

import jax
import jax.numpy as jnp
from jax.experimental import pallas as pl
from jax.experimental.pallas import tpu as pltpu

_BIG = 1e30       # finite mask bias; survives * (1/temperature) in f32
_LOG_EPS = 1e-6   # matches torch: -log(1 - sigmoid(x) + 1e-6)


def _round_up(x, m):
    return (x + m - 1) // m * m


def _normalize_kernel(x_ref, o_ref):
    """Row-wise L2 normalize (torch.nn.functional.normalize, eps=1e-12) -> bf16."""
    x = x_ref[...].astype(jnp.float32)
    ss = jnp.sum(x * x, axis=-1, keepdims=True)
    # rsqrt(max(ss, eps^2)) == 1 / max(||x||, eps); rsqrt runs on the EUP slot.
    inv = jax.lax.rsqrt(jnp.maximum(ss, 1e-24))
    o_ref[...] = (x * inv).astype(o_ref.dtype)


def _loss_kernel(fn_row_ref, fn_col_ref, real_row_ref, fake_col_ref, o_ref,
                 rf_max_ref, fr_max_ref, rf_sum_ref, fr_sum_ref,
                 n_real_ref, n_fake_ref, *, inv_temperature, tn):
    i = pl.program_id(0)
    j = pl.program_id(1)
    ni = pl.num_programs(0)
    nj = pl.num_programs(1)

    real_row = real_row_ref[...]      # [tm, 1]  1.0 = real token, 0.0 otherwise
    fake_col = fake_col_ref[...]      # [1, tn]  1.0 = fake token, 0.0 otherwise

    col_slice = pl.ds(pl.multiple_of(j * tn, tn), tn)

    @pl.when(jnp.logical_and(i == 0, j == 0))
    def _init_accumulators():
        rf_sum_ref[...] = jnp.zeros_like(rf_sum_ref)
        fr_sum_ref[...] = jnp.zeros_like(fr_sum_ref)
        n_real_ref[...] = jnp.zeros_like(n_real_ref)
        n_fake_ref[...] = jnp.zeros_like(n_fake_ref)

    @pl.when(j == 0)
    def _init_row_tile():
        rf_max_ref[...] = jnp.full_like(rf_max_ref, -_BIG)
        n_real_ref[...] += jnp.sum(real_row, keepdims=True)

    @pl.when(i == 0)
    def _init_col_tile():
        fr_max_ref[:, col_slice] = jnp.full((1, tn), -_BIG, jnp.float32)
        n_fake_ref[...] += jnp.sum(fake_col, keepdims=True)

    # [tm, tn] similarity tile: bf16 operands, f32 accumulation, contraction on
    # the last dims of both operands (no transpose).  Never written back.
    sim = jax.lax.dot_general(
        fn_row_ref[...], fn_col_ref[...],
        dimension_numbers=(((1,), (1,)), ((), ())),
        preferred_element_type=jnp.float32)

    # Additive bias masking: one VPU add per element (instead of cmp+select).
    col_bias = (fake_col - 1.0) * _BIG    # 0 on fake cols, -BIG elsewhere
    row_bias = (real_row - 1.0) * _BIG    # 0 on real rows, -BIG elsewhere

    # real -> fake: running row max over fake columns for this row tile.
    rf_max_ref[...] = jnp.maximum(
        rf_max_ref[...], jnp.max(sim + col_bias, axis=1, keepdims=True))

    # fake -> real: running column max over real rows (persistent [1, M] scratch).
    fr_max_ref[:, col_slice] = jnp.maximum(
        fr_max_ref[:, col_slice], jnp.max(sim + row_bias, axis=0, keepdims=True))

    @pl.when(j == nj - 1)
    def _finalize_row_tile():
        # Temperature applied only to the [tm,1] max (max commutes with +scale).
        x = rf_max_ref[...] * inv_temperature
        term = -jnp.log(1.0 - jax.nn.sigmoid(x) + _LOG_EPS)
        rf_sum_ref[...] += jnp.sum(term * real_row, keepdims=True)

    @pl.when(i == ni - 1)
    def _finalize_col_tile():
        x = fr_max_ref[:, col_slice] * inv_temperature
        term = -jnp.log(1.0 - jax.nn.sigmoid(x) + _LOG_EPS)
        fr_sum_ref[...] += jnp.sum(term * fake_col, keepdims=True)

    @pl.when(jnp.logical_and(i == ni - 1, j == nj - 1))
    def _finalize_output():
        nr = n_real_ref[...]
        nf = n_fake_ref[...]
        rf = rf_sum_ref[...] / jnp.maximum(nr, 1.0)
        fr = fr_sum_ref[...] / jnp.maximum(nf, 1.0)
        valid = jnp.logical_and(nr > 0.5, nf > 0.5)   # torch returns 0.0 if a class is empty
        o_ref[...] = jnp.where(valid, 0.5 * (rf + fr), jnp.float32(0.0))


def token_wise_contrastive_loss(token_features, token_masks, temperature=0.07,
                                *, tm=256, tn=512):
    """token_features: [B, N, D]; token_masks: [B, N] (1 = fake, 0 = real)."""
    B, N, D = token_features.shape
    M = B * N

    D_pad = _round_up(D, 128)
    M_pad = _round_up(M, 128)
    tm = min(tm, M_pad)
    tn = min(tn, M_pad)
    M_pad = _round_up(M_pad, math.lcm(tm, tn))

    feats = token_features.reshape(M, D)
    feats = jnp.pad(feats, ((0, M_pad - M), (0, D_pad - D)))

    labels = token_masks.reshape(M).astype(jnp.float32)
    labels = jnp.pad(labels, (0, M_pad - M), constant_values=-1.0)  # pad = neither class
    real_row = (labels == 0.0).astype(jnp.float32).reshape(M_pad, 1)
    fake_col = (labels == 1.0).astype(jnp.float32).reshape(1, M_pad)

    # --- Pre-pass: normalize each token row once, emit bf16 for the MXU. ---
    fn = pl.pallas_call(
        _normalize_kernel,
        out_shape=jax.ShapeDtypeStruct((M_pad, D_pad), jnp.bfloat16),
        grid_spec=pltpu.PrefetchScalarGridSpec(
            num_scalar_prefetch=0,
            grid=(M_pad // tm,),
            in_specs=[pl.BlockSpec((tm, D_pad), lambda i: (i, 0))],
            out_specs=pl.BlockSpec((tm, D_pad), lambda i: (i, 0))),
        compiler_params=pltpu.CompilerParams(
            dimension_semantics=("parallel",)),
    )(feats)

    ni = M_pad // tm
    nj = M_pad // tn

    # Rough VMEM budget: sim tile + double-buffered feature/mask tiles + fr scratch.
    vmem_bytes = int(min(
        100 * 1024 * 1024,
        max(16 * 1024 * 1024,
            4 * (tm * tn * 4
                 + 2 * (tm + tn) * (2 * D_pad + 4)
                 + 4 * M_pad))))

    out = pl.pallas_call(
        functools.partial(_loss_kernel,
                          inv_temperature=1.0 / float(temperature), tn=tn),
        out_shape=jax.ShapeDtypeStruct((1, 1), jnp.float32),
        grid_spec=pltpu.PrefetchScalarGridSpec(
            num_scalar_prefetch=0,
            grid=(ni, nj),
            in_specs=[
                pl.BlockSpec((tm, D_pad), lambda i, j: (i, 0)),   # row feature tile
                pl.BlockSpec((tn, D_pad), lambda i, j: (j, 0)),   # col feature tile
                pl.BlockSpec((tm, 1), lambda i, j: (i, 0)),       # real-row mask
                pl.BlockSpec((1, tn), lambda i, j: (0, j)),       # fake-col mask
            ],
            out_specs=pl.BlockSpec((1, 1), lambda i, j: (0, 0)),
            scratch_shapes=[
                pltpu.VMEM((tm, 1), jnp.float32),     # rf running row-max
                pltpu.VMEM((1, M_pad), jnp.float32),  # fr running column-max
                pltpu.VMEM((1, 1), jnp.float32),      # rf loss sum
                pltpu.VMEM((1, 1), jnp.float32),      # fr loss sum
                pltpu.VMEM((1, 1), jnp.float32),      # n_real
                pltpu.VMEM((1, 1), jnp.float32),      # n_fake
            ]),
        # Both grid axes carry cross-iteration accumulator state -> "arbitrary".
        # TODO(synk): v7x megacore split of the row-tile axis would need
        # per-core partial fr-max / loss partials plus a cross-core reduce.
        compiler_params=pltpu.CompilerParams(
            dimension_semantics=("arbitrary", "arbitrary"),
            vmem_limit_bytes=vmem_bytes),
        cost_estimate=pl.CostEstimate(
            flops=2 * M_pad * M_pad * D_pad,
            transcendentals=4 * M_pad,
            bytes_accessed=2 * M_pad * D_pad * 2 + 8 * M_pad + 4),
    )(fn, fn, real_row, fake_col)
    return out[0, 0]


if __name__ == "__main__":
    import numpy as np

    def reference(token_features, token_masks, temperature=0.07):
        f = np.asarray(token_features, dtype=np.float64)
        D = f.shape[-1]
        f = f.reshape(-1, D)
        lab = np.asarray(token_masks, dtype=np.float64).reshape(-1)
        f = f / np.maximum(np.linalg.norm(f, axis=1, keepdims=True), 1e-12)
        real = f[lab == 0]
        fake = f[lab == 1]
        if len(real) == 0 or len(fake) == 0:
            return 0.0
        S = real @ fake.T / temperature
        sig = lambda x: 1.0 / (1.0 + np.exp(-x))
        l1 = -np.log(1.0 - sig(S.max(axis=1)) + 1e-6).mean()
        l2 = -np.log(1.0 - sig(S.T.max(axis=1)) + 1e-6).mean()
        return (l1 + l2) / 2.0

    key = jax.random.PRNGKey(0)

    # Small shape from the module spec: B=2, N=8, D=32 (single-tile grid).
    kf, km, key = jax.random.split(key, 3)
    B, N, D = 2, 8, 32
    feats1 = jax.random.normal(kf, (B, N, D), dtype=jnp.float32)
    masks1 = (jax.random.uniform(km, (B, N)) > 0.5).astype(jnp.float32)
    loss1 = jax.block_until_ready(token_wise_contrastive_loss(feats1, masks1))
    ref1 = reference(feats1, masks1)
    assert np.allclose(float(loss1), ref1, rtol=2e-2, atol=2e-2), (float(loss1), ref1)

    # Larger shape exercising the multi-tile grid + padding path.
    kf, km, key = jax.random.split(key, 3)
    B, N, D = 2, 300, 32
    feats2 = jax.random.normal(kf, (B, N, D), dtype=jnp.float32)
    masks2 = (jax.random.uniform(km, (B, N)) > 0.5).astype(jnp.float32)
    loss2 = jax.block_until_ready(token_wise_contrastive_loss(feats2, masks2))
    ref2 = reference(feats2, masks2)
    assert np.allclose(float(loss2), ref2, rtol=2e-2, atol=2e-2), (float(loss2), ref2)

    print("KERNEL_OK")
</pallas_src>

<mosaic_0001>
module attributes {stable_mosaic.version = 11 : i64} {
  func.func @_normalize_kernel(%arg0: i32, %arg1: memref<128x128xf32, #tpu.memory_space<vmem>>, %arg2: memref<128x128xbf16, #tpu.memory_space<vmem>>) attributes {dimension_semantics = [#tpu.dimension_semantics<parallel>], iteration_bounds = array<i64: 1>, scalar_prefetch = 0 : i64, scratch_operands = 0 : i64, tpu.core_type = #tpu.core_type<tc>, window_params = [{transform_indices = @transform_0, window_bounds = array<i64: 128, 128>}, {transform_indices = @transform_1, window_bounds = array<i64: 128, 128>}]} {
    %c0 = arith.constant 0 : index
    %c0_0 = arith.constant 0 : index
    %0 = vector.load %arg1[%c0, %c0_0] : memref<128x128xf32, #tpu.memory_space<vmem>>, vector<128x128xf32>
    %1 = arith.mulf %0, %0 : vector<128x128xf32>
    %cst = arith.constant dense<0.000000e+00> : vector<128xf32>
    %2 = vector.multi_reduction <add>, %1, %cst [1] : vector<128x128xf32> to vector<128xf32>
    %3 = vector.shape_cast %2 : vector<128xf32> to vector<128x1xf32>
    %cst_1 = arith.constant 1.000000e-24 : f32
    %4 = vector.broadcast %cst_1 : f32 to vector<128x1xf32>
    %5 = arith.maximumf %3, %4 : vector<128x1xf32>
    %6 = math.rsqrt %5 : vector<128x1xf32>
    %7 = vector.broadcast %6 : vector<128x1xf32> to vector<128x128xf32>
    %8 = arith.mulf %0, %7 : vector<128x128xf32>
    %9 = arith.truncf %8 : vector<128x128xf32> to vector<128x128xbf16>
    %c0_2 = arith.constant 0 : index
    %c0_3 = arith.constant 0 : index
    %10 = vector.load %arg2[%c0_2, %c0_3] : memref<128x128xbf16, #tpu.memory_space<vmem>>, vector<128x128xbf16>
    tpu.vector_store %arg2[%c0_2, %c0_3], %9 {strides = array<i32>} : memref<128x128xbf16, #tpu.memory_space<vmem>>, vector<128x128xbf16>,
    return
  }
  func.func @transform_0(%arg0: i32) -> (i32, i32) {
    %c0_i32 = arith.constant 0 : i32
    %c0_i32_0 = arith.constant 0 : i32
    return %arg0, %c0_i32 : i32, i32
  }
  func.func @transform_1(%arg0: i32) -> (i32, i32) {
    %c0_i32 = arith.constant 0 : i32
    %c0_i32_0 = arith.constant 0 : i32
    return %arg0, %c0_i32 : i32, i32
  }
}

</mosaic_0001>

<bundles_post_ra>
// kernel: tpu_custom_call.1
= control target key start
LH: loop header
LB: loop body
LE: loop exit
PB: predicated region body
PF: predicated region fallthrough
CT: control target
= control target key end

     0   :  { %6 = vsyncpa [#allocation3], 0  ;;  %s517_s0 = inlined_call_operand.hbm [shape: f32[128,128], index: 0, kind: input, shape index: {}]   ;;  %s518_s1 = inlined_call_operand.hbm [shape: bf16[128,128], index: 1, kind: output, shape index: {}]  }
   0x1   :  { %7 = vsyncpa [#allocation4], 0  ;;  %s397_s6 = smov [#allocation2]   ;;  %s349_s10 = scalar_lea.hbm %s517_s0, 2048 }
   0x2   :  { %s13_s7 = sshll.u32 %s397_s6, 4  ;;  %p350_p0 = scmp.ne.s32.totalorder %s517_s0, %s349_s10  ;;  %s14_s7 = int_to_ptr.vmem [resolvable:$true] %s13_s7 }
   0x3   :  { %p353_p1 = scmp.lt.u32.totalorder %s349_s10, %s517_s0 }
   0x5   :  { %p355_p2 = pnand %p353_p1, %p350_p0 }
   0x7   :  { %358 = shalt.err (!%p355_p2)
}
   0x8   :  { %s359_s15 = scalar_lea.vmem %s14_s7, 2048  ;;  %p364_p4 = scmp.lt.s32.totalorder %s14_s7, %s14_s7 }
   0x9   :  { %p360_p3 = scmp.ne.s32.totalorder %s14_s7, %s359_s15  ;;  %p365_p5 = scmp.lt.s32.totalorder %s359_s15, %s359_s15 }
   0xb   :  { %p366_p6 = por %p365_p5, %p364_p4 }
   0xd   :  { %p367_p7 = pnand %p366_p6, %p360_p3 }
   0xf   :  { %370 = shalt.err (!%p367_p7)
}
  0x10   :  { %s398_s16 = smov 128   ;;  %s399_s17 = smov 8  }
  0x11   :  { %19 = dma.hbm_to_vmem [thread:$0]  %s517_s0, 2048, %s14_s7, [#allocation3], %s398_s16, %s398_s16, %s399_s17  }
  0x12   :  { %393 = dma.done.wait [#allocation3], 2048  }
  0x13   :  { %394 = vsyncadd [#allocation3], 4294965248  ;;  %v425_v0 = vld [vmem:[#allocation2 + $0x10] sm:$0xff]  ;;  %v427_v1 = vld [vmem:[#allocation2] sm:$0xff]  ;;  %s400_s0 = smov [#allocation5]  }
  0x14   :  { %v429_v2 = vld [vmem:[#allocation2 + $0x18] sm:$0xff]  ;;  %v41_v3 = vmul.f32 %v425_v0, %v425_v0  ;;  %v39_v4 = vmul.f32 %v427_v1, %v427_v1  ;;  %v435_v5 = vld [vmem:[#allocation2 + $0x8] sm:$0xff]  ;;  %v443_v9 = vld [vmem:[#allocation2 + $0x20] sm:$0xff]  ;;  %s220_s20 = sshll.u32 %s400_s0, 4  ;;  %s221_s20 = int_to_ptr.vmem [resolvable:$true] %s220_s20 }
  0x15   :  { %v42_v6 = vmul.f32 %v429_v2, %v429_v2  ;;  %v40_v7 = vmul.f32 %v435_v5, %v435_v5  ;;  %v441_v8 = vld [vmem:[#allocation2 + $0x28] sm:$0xff]  ;;  %v43_v11 = vmul.f32 %v443_v9, %v443_v9  ;;  %v449_v12 = vld [vmem:[#allocation2 + $0x38] sm:$0xff]  ;;  %v451_v13 = vld [vmem:[#allocation2 + $0x30] sm:$0xff]  ;;  %s371_s21 = scalar_lea.vmem %s221_s20, 1024  ;;  %p376_p9 = scmp.lt.s32.totalorder %s221_s20, %s221_s20 }
  0x16   :  { %59 = vadd.xlane.f32.xlu1 %v41_v3  ;;  %55 = vadd.xlane.f32.xlu0 %v39_v4  ;;  %v44_v10 = vmul.f32 %v441_v8, %v441_v8  ;;  %v46_v14 = vmul.f32 %v449_v12, %v449_v12  ;;  %v45_v15 = vmul.f32 %v451_v13, %v451_v13  ;;  %v457_v16 = vld [vmem:[#allocation2 + $0x48] sm:$0xff]  ;;  %v459_v17 = vld [vmem:[#allocation2 + $0x40] sm:$0xff]  ;;  %v465_v20 = vld [vmem:[#allocation2 + $0x58] sm:$0xff]  ;;  %p372_p8 = scmp.ne.s32.totalorder %s221_s20, %s371_s21  ;;  %p377_p10 = scmp.lt.s32.totalorder %s371_s21, %s371_s21 }
  0x17   :  { %v48_v18 = vmul.f32 %v457_v16, %v457_v16  ;;  %v47_v19 = vmul.f32 %v459_v17, %v459_v17  ;;  %v467_v21 = vld [vmem:[#allocation2 + $0x50] sm:$0xff]  ;;  %v50_v22 = vmul.f32 %v465_v20, %v465_v20  ;;  %v473_v24 = vld [vmem:[#allocation2 + $0x68] sm:$0xff]  ;;  %v475_v25 = vld [vmem:[#allocation2 + $0x60] sm:$0xff] }
  0x18   :  { %v49_v23 = vmul.f32 %v467_v21, %v467_v21  ;;  %v52_v26 = vmul.f32 %v473_v24, %v473_v24  ;;  %v51_v27 = vmul.f32 %v475_v25, %v475_v25  ;;  %v481_v28 = vld [vmem:[#allocation2 + $0x78] sm:$0xff]  ;;  %v483_v29 = vld [vmem:[#allocation2 + $0x70] sm:$0xff]  ;;  %p378_p11 = por %p377_p10, %p376_p9 }
  0x19   :  { %v54_v30 = vmul.f32 %v481_v28, %v481_v28  ;;  %v53_v31 = vmul.f32 %v483_v29, %v483_v29 }
  0x1a   :  { %61 = vadd.xlane.f32.xlu1 %v42_v6  ;;  %57 = vadd.xlane.f32.xlu0 %v40_v7  ;;  %p379_p12 = pnand %p378_p11, %p372_p8 }
  0x1e   :  { %65 = vadd.xlane.f32.xlu1 %v44_v10  ;;  %63 = vadd.xlane.f32.xlu0 %v43_v11 }
  0x22   :  { %69 = vadd.xlane.f32.xlu1 %v46_v14  ;;  %67 = vadd.xlane.f32.xlu0 %v45_v15 }
  0x26   :  { %73 = vadd.xlane.f32.xlu1 %v48_v18  ;;  %71 = vadd.xlane.f32.xlu0 %v47_v19 }
  0x2a   :  { %77 = vadd.xlane.f32.xlu1 %v50_v22  ;;  %75 = vadd.xlane.f32.xlu0 %v49_v23 }
  0x2e   :  { %81 = vadd.xlane.f32.xlu1 %v52_v26  ;;  %79 = vadd.xlane.f32.xlu0 %v51_v27 }
  0x32   :  { %85 = vadd.xlane.f32.xlu1 %v54_v30  ;;  %83 = vadd.xlane.f32.xlu0 %v53_v31 }
  0xa3   :  { %v60_v32 = vpop.xlane.xlu1 %59  ;;  %v56_v33 = vpop.xlane.xlu0 %55 }
  0xa4   :  { %v89_v34 = vmax.f32 %v60_v32, 1e-24  ;;  %v87_v35 = vmax.f32 %v56_v33, 1e-24 }
  0xa6   :  { %317 = vrsqrt.f32 %v89_v34 }
  0xa7   :  { %v62_v36 = vpop.xlane.xlu1 %61  ;;  %v58_v37 = vpop.xlane.xlu0 %57  ;;  %319 = vrsqrt.f32 %v87_v35 }
  0xa8   :  { %v90_v38 = vmax.f32 %v62_v36, 1e-24  ;;  %v88_v39 = vmax.f32 %v58_v37, 1e-24 }
  0xaa   :  { %321 = vrsqrt.f32 %v90_v38 }
  0xab   :  { %323 = vrsqrt.f32 %v88_v39  ;;  %v66_v40 = vpop.xlane.xlu1 %65  ;;  %v64_v41 = vpop.xlane.xlu0 %63 }
  0xac   :  { %v92_v42 = vmax.f32 %v66_v40, 1e-24  ;;  %v91_v43 = vmax.f32 %v64_v41, 1e-24 }
  0xae   :  { %325 = vrsqrt.f32 %v92_v42 }
  0xaf   :  { %327 = vrsqrt.f32 %v91_v43  ;;  %v70_v44 = vpop.xlane.xlu1 %69  ;;  %v68_v45 = vpop.xlane.xlu0 %67 }
  0xb0   :  { %v94_v46 = vmax.f32 %v70_v44, 1e-24  ;;  %v93_v47 = vmax.f32 %v68_v45, 1e-24  ;;  %v318_v48 = vpop.eup %317 }
  0xb1   :  { %v320_v49 = vpop.eup %319  ;;  %v121_v56 = vmul.f32 %v318_v48, %v425_v0 }
  0xb2   :  { %329 = vrsqrt.f32 %v94_v46  ;;  %v119_v58 = vmul.f32 %v320_v49, %v427_v1 }
  0xb3   :  { %331 = vrsqrt.f32 %v93_v47  ;;  %v74_v50 = vpop.xlane.xlu1 %73  ;;  %v72_v51 = vpop.xlane.xlu0 %71 }
  0xb4   :  { %v322_v52 = vpop.eup %321  ;;  %v96_v53 = vmax.f32 %v74_v50, 1e-24  ;;  %v95_v54 = vmax.f32 %v72_v51, 1e-24 }
  0xb5   :  { %v324_v55 = vpop.eup %323  ;;  %v122_v57 = vmul.f32 %v322_v52, %v429_v2 }
  0xb6   :  { %v120_v59 = vmul.f32 %v324_v55, %v435_v5  ;;  %333 = vrsqrt.f32 %v96_v53 }
  0xb7   :  { %v272_v60 = vpack.c.bf16 %v122_v57, %v121_v56  ;;  %335 = vrsqrt.f32 %v95_v54  ;;  %v78_v61 = vpop.xlane.xlu1 %77  ;;  %v76_v62 = vpop.xlane.xlu0 %75 }
  0xb8   :  { %v326_v63 = vpop.eup %325  ;;  %v267_v3 = vpack.c.bf16 %v120_v59, %v119_v58  ;;  %v98_v4 = vmax.f32 %v78_v61, 1e-24  ;;  %v97_v6 = vmax.f32 %v76_v62, 1e-24 }
  0xb9   :  { %v328_v7 = vpop.eup %327  ;;  %304 = vst [vmem:[#allocation5 + $0x8] sm:$0xff] %v272_v60   ;;  %v124_v10 = vmul.f32 %v326_v63, %v441_v8 }
  0xba   :  { %268 = vst [vmem:[#allocation5] sm:$0xff] %v267_v3   ;;  %v123_v0 = vmul.f32 %v328_v7, %v443_v9  ;;  %337 = vrsqrt.f32 %v98_v4 }
  0xbb   :  { %339 = vrsqrt.f32 %v97_v6  ;;  %v82_v1 = vpop.xlane.xlu1 %81  ;;  %v80_v2 = vpop.xlane.xlu0 %79 }
  0xbc   :  { %v330_v5 = vpop.eup %329  ;;  %v277_v11 = vpack.c.bf16 %v124_v10, %v123_v0  ;;  %v100_v14 = vmax.f32 %v82_v1, 1e-24  ;;  %v99_v15 = vmax.f32 %v80_v2, 1e-24 }
  0xbd   :  { %v332_v18 = vpop.eup %331  ;;  %v126_v19 = vmul.f32 %v330_v5, %v449_v12 }
  0xbe   :  { %305 = vst [vmem:[#allocation5 + $0x10] sm:$0xff] %v277_v11   ;;  %v125_v22 = vmul.f32 %v332_v18, %v451_v13  ;;  %341 = vrsqrt.f32 %v100_v14 }
  0xbf   :  { %343 = vrsqrt.f32 %v99_v15  ;;  %v86_v8 = vpop.xlane.xlu1 %85  ;;  %v84_v23 = vpop.xlane.xlu0 %83 }
  0xc0   :  { %v334_v26 = vpop.eup %333  ;;  %v282_v9 = vpack.c.bf16 %v126_v19, %v125_v22  ;;  %v102_v27 = vmax.f32 %v86_v8, 1e-24  ;;  %v101_v30 = vmax.f32 %v84_v23, 1e-24 }
  0xc1   :  { %v336_v31 = vpop.eup %335  ;;  %v128_v32 = vmul.f32 %v334_v26, %v457_v16 }
  0xc2   :  { %306 = vst [vmem:[#allocation5 + $0x18] sm:$0xff] %v282_v9   ;;  %v127_v33 = vmul.f32 %v336_v31, %v459_v17  ;;  %345 = vrsqrt.f32 %v102_v27 }
  0xc3   :  { %347 = vrsqrt.f32 %v101_v30 }
  0xc4   :  { %v338_v12 = vpop.eup %337  ;;  %v287_v34 = vpack.c.bf16 %v128_v32, %v127_v33 }
  0xc5   :  { %v340_v35 = vpop.eup %339  ;;  %v130_v13 = vmul.f32 %v338_v12, %v465_v20 }
  0xc6   :  { %307 = vst [vmem:[#allocation5 + $0x20] sm:$0xff] %v287_v34   ;;  %v129_v36 = vmul.f32 %v340_v35, %v467_v21 }
  0xc8   :  { %v342_v37 = vpop.eup %341  ;;  %v292_v38 = vpack.c.bf16 %v130_v13, %v129_v36 }
  0xc9   :  { %v344_v39 = vpop.eup %343  ;;  %v132_v40 = vmul.f32 %v342_v37, %v473_v24 }
  0xca   :  { %308 = vst [vmem:[#allocation5 + $0x28] sm:$0xff] %v292_v38   ;;  %v131_v16 = vmul.f32 %v344_v39, %v475_v25 }
  0xcc   :  { %v346_v41 = vpop.eup %345  ;;  %v297_v17 = vpack.c.bf16 %v132_v40, %v131_v16 }
  0xcd   :  { %v348_v42 = vpop.eup %347  ;;  %v134_v43 = vmul.f32 %v346_v41, %v481_v28 }
  0xce   :  { %309 = vst [vmem:[#allocation5 + $0x30] sm:$0xff] %v297_v17   ;;  %v133_v20 = vmul.f32 %v348_v42, %v483_v29 }
  0xd0   :  { %v302_v21 = vpack.c.bf16 %v134_v43, %v133_v20 }
  0xd2   :  { %310 = vst [vmem:[#allocation5 + $0x38] sm:$0xff] %v302_v21  }
  0xd3   :  { %382 = shalt.err (!%p379_p12)
}
  0xd4   :  { %s383_s24 = scalar_lea.hbm %s518_s1, 1024 }
  0xd5   :  { %p384_p13 = scmp.ne.s32.totalorder %s518_s1, %s383_s24  ;;  %p387_p0 = scmp.lt.u32.totalorder %s383_s24, %s518_s1 }
  0xd7   :  { %p389_p1 = pnand %p387_p0, %p384_p13 }
  0xd9   :  { %392 = shalt.err (!%p389_p1)
}
  0xda   :  { %s401_s29 = smov 64   ;;  %s402_s30 = smov 4  }
  0xdb   :  { %226 = dma.vmem_to_hbm [thread:$0]  %s221_s20, 1024, %s518_s1, [#allocation4], %s401_s29, %s401_s29, %s402_s30  }
  0xdc   :  { %395 = dma.done.wait [#allocation4], 1024  }
  0xdd   :  { %396 = vsyncadd [#allocation4], 4294966272 }
  0xde   :  { %230 = vsyncpa [#allocation3], 1 }
  0xdf   :  { %231 = vsyncpa [#allocation4], 1 }

</bundles_post_ra>
